<compile_context>
chip_gen: v6e
topology: v6e:2x2x1
jax: 0.10.0
libtpu: 0.0.40
codegen_flags: <defaults>
</compile_context>

<pallas_src>
import math
import functools

import jax
import jax.numpy as jnp
from jax.experimental import pallas as pl
from jax.experimental.pallas import tpu as pltpu


def _dpa_kernel(vl_ref, q_ref, k_ref, v_ref, out_ref, *, scale):
    """One batch element per grid step.

    vl_ref : (B,) int32 in SMEM (scalar prefetch)
    q_ref  : (Lq, d)  bf16 VMEM tile
    k_ref  : (Lk, d)  bf16 VMEM tile
    v_ref  : (Lk, dv) bf16 VMEM tile
    out_ref: (Lq, dv) f32  VMEM tile
    """
    b = pl.program_id(0)

    q = q_ref[...]
    k = k_ref[...]
    v = v_ref[...]

    # scores = Q @ K^T with f32 accumulation on the MXU (contract over d, no
    # materialized transpose).
    scores = jax.lax.dot_general(
        q, k,
        dimension_numbers=(((1,), (1,)), ((), ())),
        preferred_element_type=jnp.float32,
    )                                                # (Lq, Lk) f32
    Lq, Lk = scores.shape

    # masked_softmax: key positions >= valid_len get -1e6 before softmax.
    # The 1/sqrt(d) scale is fused into the same `where` (scores tile is the
    # smallest tensor here). valid_len is a scalar read from SMEM.
    valid = vl_ref[b]                                # scalar int32
    key_idx = jax.lax.broadcasted_iota(jnp.int32, (Lq, Lk), 1)
    scores = jnp.where(key_idx < valid, scores * scale, -1000000.0)

    # Numerically-stable softmax in f32; reciprocal on the (otherwise idle) EUP
    # slot. NOTE: approx=True is not bit-exact (~1e-3/1e-4 rel error).
    scores = scores - jnp.max(scores, axis=-1, keepdims=True)
    e = jnp.exp(scores)
    attn = e * pl.reciprocal(jnp.sum(e, axis=-1, keepdims=True), approx=True)

    # Dropout on attn is identity at inference.
    out = jnp.dot(attn.astype(v.dtype), v, preferred_element_type=jnp.float32)
    out_ref[...] = out.astype(out_ref.dtype)


def dot_product_attention(queries, keys, values, valid_lens=None):
    """queries (B,Lq,d), keys (B,Lk,d), values (B,Lk,dv), valid_lens (B,) or None."""
    B, Lq, d = queries.shape
    _, Lk, dv = values.shape

    if valid_lens is None:
        valid_lens = jnp.full((B,), Lk, dtype=jnp.int32)
    elif valid_lens.ndim != 1:
        # TODO(synk): per-query (B, Lq) valid_lens (general d2l masked_softmax) not
        # implemented in this kernel; only (B,) or None is supported.
        raise NotImplementedError("only 1-D valid_lens (B,) or None is supported")
    vl = valid_lens.astype(jnp.int32)

    kernel = functools.partial(_dpa_kernel, scale=1.0 / math.sqrt(d))

    grid_spec = pltpu.PrefetchScalarGridSpec(
        num_scalar_prefetch=1,          # valid_lens -> SMEM, scalar path only
        grid=(B,),                      # one batch element per step
        in_specs=[
            pl.BlockSpec((None, Lq, d), lambda b, vl: (b, 0, 0)),   # queries
            pl.BlockSpec((None, Lk, d), lambda b, vl: (b, 0, 0)),   # keys
            pl.BlockSpec((None, Lk, dv), lambda b, vl: (b, 0, 0)),  # values
        ],
        out_specs=pl.BlockSpec((None, Lq, dv), lambda b, vl: (b, 0, 0)),
    )

    return pl.pallas_call(
        kernel,
        out_shape=jax.ShapeDtypeStruct((B, Lq, dv), jnp.float32),
        grid_spec=grid_spec,
        compiler_params=pltpu.CompilerParams(
            dimension_semantics=("parallel",),   # batch axis -> both TCs on v7x
        ),
    )(vl,
      queries.astype(jnp.bfloat16),
      keys.astype(jnp.bfloat16),
      values.astype(jnp.bfloat16))


def reference(queries, keys, values, valid_lens):
    # Pure-JAX (f32) mirror of the PyTorch DotProductAttention forward (dropout = identity).
    d = queries.shape[-1]
    scores = jnp.einsum("bqd,bkd->bqk", queries, keys) / math.sqrt(d)
    if valid_lens is not None:
        Lk = keys.shape[1]
        mask = jnp.arange(Lk)[None, None, :] < valid_lens[:, None, None]
        scores = jnp.where(mask, scores, -1000000.0)
    attn = jax.nn.softmax(scores, axis=-1)
    return jnp.einsum("bqk,bkd->bqd", attn, values)


if __name__ == "__main__":
    B, Lq, Lk, D = 2, 8, 8, 32    # batch, query len, key len, feature dim

    key = jax.random.PRNGKey(0)
    kq, kk, kv = jax.random.split(key, 3)
    queries = jax.random.normal(kq, (B, Lq, D), dtype=jnp.float32)
    keys = jax.random.normal(kk, (B, Lk, D), dtype=jnp.float32)
    values = jax.random.normal(kv, (B, Lk, D), dtype=jnp.float32)
    valid_lens = jnp.array([5, 8], dtype=jnp.int32)

    out = dot_product_attention(queries, keys, values, valid_lens)
    out = jax.block_until_ready(out)

    ref = reference(queries, keys, values, valid_lens)
    assert out.shape == (B, Lq, D)
    # bf16 MXU operands + EUP approx reciprocal vs. pure-f32 reference -> 5e-2 tolerance.
    assert jnp.allclose(out, ref, rtol=5e-2, atol=5e-2), "mismatch vs pure-JAX reference"

    # Also exercise the valid_lens=None (plain softmax) path.
    out_none = jax.block_until_ready(dot_product_attention(queries, keys, values, None))
    ref_none = reference(queries, keys, values, None)
    assert jnp.allclose(out_none, ref_none, rtol=5e-2, atol=5e-2), "mismatch (no mask)"

    print("KERNEL_OK")
</pallas_src>

<mosaic_0001>
module attributes {stable_mosaic.version = 11 : i64} {
  func.func @_dpa_kernel(%arg0: i32, %arg1: memref<2xi32, #tpu.memory_space<smem>>, %arg2: memref<1x8x32xbf16, #tpu.memory_space<vmem>>, %arg3: memref<1x8x32xbf16, #tpu.memory_space<vmem>>, %arg4: memref<1x8x32xbf16, #tpu.memory_space<vmem>>, %arg5: memref<1x8x32xf32, #tpu.memory_space<vmem>>) attributes {dimension_semantics = [#tpu.dimension_semantics<parallel>], iteration_bounds = array<i64: 2>, scalar_prefetch = 1 : i64, scratch_operands = 0 : i64, tpu.core_type = #tpu.core_type<tc>, window_params = [{transform_indices = @transform_0, window_bounds = array<i64: 1, 8, 32>}, {transform_indices = @transform_1, window_bounds = array<i64: 1, 8, 32>}, {transform_indices = @transform_2, window_bounds = array<i64: 1, 8, 32>}, {transform_indices = @transform_3, window_bounds = array<i64: 1, 8, 32>}]} {
    %c0 = arith.constant 0 : index
    %c0_0 = arith.constant 0 : index
    %c0_1 = arith.constant 0 : index
    %0 = vector.load %arg2[%c0, %c0_0, %c0_1] : memref<1x8x32xbf16, #tpu.memory_space<vmem>>, vector<1x8x32xbf16>
    %1 = vector.shape_cast %0 : vector<1x8x32xbf16> to vector<8x32xbf16>
    %c0_2 = arith.constant 0 : index
    %c0_3 = arith.constant 0 : index
    %c0_4 = arith.constant 0 : index
    %2 = vector.load %arg3[%c0_2, %c0_3, %c0_4] : memref<1x8x32xbf16, #tpu.memory_space<vmem>>, vector<1x8x32xbf16>
    %3 = vector.shape_cast %2 : vector<1x8x32xbf16> to vector<8x32xbf16>
    %c0_5 = arith.constant 0 : index
    %c0_6 = arith.constant 0 : index
    %c0_7 = arith.constant 0 : index
    %4 = vector.load %arg4[%c0_5, %c0_6, %c0_7] : memref<1x8x32xbf16, #tpu.memory_space<vmem>>, vector<1x8x32xbf16>
    %5 = vector.shape_cast %4 : vector<1x8x32xbf16> to vector<8x32xbf16>
    %cst = arith.constant dense<0.000000e+00> : vector<8x8xf32>
    %6 = tpu.matmul %1, %3, %cst {dimension_numbers = #tpu.dot_dimension_numbers<[1], [1], [0], [0], [0, 0, 1, 0], [], []>} : vector<8x32xbf16>, vector<8x32xbf16>, vector<8x8xf32> -> vector<8x8xf32>
    %7 = arith.index_cast %arg0 : i32 to index
    %8 = memref.load %arg1[%7] : memref<2xi32, #tpu.memory_space<smem>>
    %9 = tpu.iota {dimensions = array<i32: 1>} : vector<8x8xi32>
    %10 = vector.broadcast %8 : i32 to vector<8x8xi32>
    %11 = arith.cmpi slt, %9, %10 : vector<8x8xi32>
    %cst_8 = arith.constant 0.176776692 : f32
    %12 = vector.broadcast %cst_8 : f32 to vector<8x8xf32>
    %13 = arith.mulf %6, %12 : vector<8x8xf32>
    %cst_9 = arith.constant -1.000000e+06 : f32
    %14 = vector.broadcast %cst_9 : f32 to vector<8x8xf32>
    %15 = arith.select %11, %13, %14 : vector<8x8xi1>, vector<8x8xf32>
    %cst_10 = arith.constant dense<0xFF800000> : vector<8xf32>
    %16 = vector.multi_reduction <maximumf>, %15, %cst_10 [1] : vector<8x8xf32> to vector<8xf32>
    %17 = vector.shape_cast %16 : vector<8xf32> to vector<8x1xf32>
    %18 = vector.broadcast %17 : vector<8x1xf32> to vector<8x8xf32>
    %19 = arith.subf %15, %18 : vector<8x8xf32>
    %20 = math.exp %19 : vector<8x8xf32>
    %cst_11 = arith.constant dense<0.000000e+00> : vector<8xf32>
    %21 = vector.multi_reduction <add>, %20, %cst_11 [1] : vector<8x8xf32> to vector<8xf32>
    %22 = vector.shape_cast %21 : vector<8xf32> to vector<8x1xf32>
    %23 = tpu.reciprocal %22 {approx = true} : vector<8x1xf32> -> vector<8x1xf32>
    %24 = vector.broadcast %23 : vector<8x1xf32> to vector<8x8xf32>
    %25 = arith.mulf %20, %24 : vector<8x8xf32>
    %26 = arith.truncf %25 : vector<8x8xf32> to vector<8x8xbf16>
    %cst_12 = arith.constant dense<0.000000e+00> : vector<8x32xf32>
    %27 = tpu.matmul %26, %5, %cst_12 {dimension_numbers = #tpu.dot_dimension_numbers<[1], [0], [0], [1], [0, 0, 1, 1], [], []>} : vector<8x8xbf16>, vector<8x32xbf16>, vector<8x32xf32> -> vector<8x32xf32>
    %c0_13 = arith.constant 0 : index
    %c0_14 = arith.constant 0 : index
    %c0_15 = arith.constant 0 : index
    %28 = vector.load %arg5[%c0_13, %c0_14, %c0_15] : memref<1x8x32xf32, #tpu.memory_space<vmem>>, vector<1x8x32xf32>
    %29 = vector.shape_cast %28 : vector<1x8x32xf32> to vector<8x32xf32>
    %30 = vector.shape_cast %27 : vector<8x32xf32> to vector<1x8x32xf32>
    tpu.vector_store %arg5[%c0_13, %c0_14, %c0_15], %30 {strides = array<i32>} : memref<1x8x32xf32, #tpu.memory_space<vmem>>, vector<1x8x32xf32>,
    return
  }
  func.func @transform_0(%arg0: i32, %arg1: memref<2xi32, #tpu.memory_space<smem>>) -> (i32, i32, i32) {
    %c0_i32 = arith.constant 0 : i32
    %c0_i32_0 = arith.constant 0 : i32
    %c0_i32_1 = arith.constant 0 : i32
    return %arg0, %c0_i32, %c0_i32_0 : i32, i32, i32
  }
  func.func @transform_1(%arg0: i32, %arg1: memref<2xi32, #tpu.memory_space<smem>>) -> (i32, i32, i32) {
    %c0_i32 = arith.constant 0 : i32
    %c0_i32_0 = arith.constant 0 : i32
    %c0_i32_1 = arith.constant 0 : i32
    return %arg0, %c0_i32, %c0_i32_0 : i32, i32, i32
  }
  func.func @transform_2(%arg0: i32, %arg1: memref<2xi32, #tpu.memory_space<smem>>) -> (i32, i32, i32) {
    %c0_i32 = arith.constant 0 : i32
    %c0_i32_0 = arith.constant 0 : i32
    %c0_i32_1 = arith.constant 0 : i32
    return %arg0, %c0_i32, %c0_i32_0 : i32, i32, i32
  }
  func.func @transform_3(%arg0: i32, %arg1: memref<2xi32, #tpu.memory_space<smem>>) -> (i32, i32, i32) {
    %c0_i32 = arith.constant 0 : i32
    %c0_i32_0 = arith.constant 0 : i32
    %c0_i32_1 = arith.constant 0 : i32
    return %arg0, %c0_i32, %c0_i32_0 : i32, i32, i32
  }
}

</mosaic_0001>

<bundles_post_ra>
// kernel: tpu_custom_call.1
= control target key start
LH: loop header
LB: loop body
LE: loop exit
PB: predicated region body
PF: predicated region fallthrough
CT: control target
= control target key end

     0   :  { %s771_s15 = smov [#allocation3]   ;;  %s1032_s0 = inlined_call_operand.hbm [shape: s32[2], index: 0, kind: input, shape index: {}]   ;;  %s1033_s1 = inlined_call_operand.hbm [shape: bf16[2,8,32], index: 1, kind: input, shape index: {}]   ;;  %s1034_s2 = inlined_call_operand.hbm [shape: bf16[2,8,32], index: 2, kind: input, shape index: {}]   ;;  %s1035_s3 = inlined_call_operand.hbm [shape: bf16[2,8,32], index: 3, kind: input, shape index: {}]   ;;  %s1036_s4 = inlined_call_operand.hbm [shape: f32[2,8,32], index: 4, kind: output, shape index: {}]  }
   0x1   :  { %1040 = sst [smem:[#allocation16_spill]] %s1033_s1 }
   0x2   :  { %1041 = sst [smem:[#allocation17_spill]] %s1034_s2 }
   0x3   :  { %10 = dma.hbm_to_smem %s1032_s0, 16, %s771_s15, [#allocation2] }
   0x4   :  { %741 = dma.done.wait [#allocation2], 16 }
   0x5   :  { %742 = vsyncadd [#allocation2], 4294967280 }
   0x6   :  { %12 = sfence }
   0x7   :  { %13 = vsyncpa [#allocation5], 0 }
   0x8   :  { %15 = vsyncpa [#allocation5 + $0x1], 0 }
   0x9   :  { %16 = vsyncpa [#allocation8], 0 }
   0xa   :  { %18 = vsyncpa [#allocation8 + $0x1], 0 }
   0xb   :  { %19 = vsyncpa [#allocation6], 0 }
   0xc   :  { %21 = vsyncpa [#allocation6 + $0x1], 0  ;;  %s806_s18 = smov 0   ;;  %s808_s19 = smov 0  }
   0xd   :  { %s810_s20 = smov 0   ;;  %s812_s21 = smov 0  }
   0xe LB: > { %s827_s0 = sadd.s32 4294967295, %s769_s21   ;;  %s508_s22 = sadd.s32 4294967294, %s769_s21   ;;  %s769_s21 = sphi %s812_s21, %s1062_s21   ;;  %s765_s20 = sphi %s810_s20, %s1061_s20   ;;  %s761_s19 = sphi %s808_s19, %s1060_s19   ;;  %s757_s18 = sphi %s806_s18, %s1059_s18  }
   0xf   : > { %s831_s23 = sadd.s32 1, %s769_s21   ;;  %s34_s24 = sadd.s32 1, %s765_s20 }
  0x10   : > { %s31_s25 = ssub.s32 %s769_s21, %s831_s23  ;;  %p41_p0 = scmp.ne.s32.totalorder %s765_s20, %s761_s19 }
  0x11   : > { %p32_p1 = scmp.eq.s32.totalorder %s31_s25, 0  ;;  %p42_p2 = scmp.eq.s32.totalorder %s769_s21, 0 }
  0x12   : > { %p47_p3 = scmp.ne.s32.totalorder %s761_s19, %s757_s18  ;;  %p48_p4 = scmp.eq.s32.totalorder %s827_s0, 0 }
  0x13   : > { %s843_s26 = scalar_select %p32_p1, %s765_s20, %s34_s24  }
  0x14   : > { %p43_p5 = por %p42_p2, %p41_p0  ;;  %p845_p6 = por %p48_p4, %p47_p3 }
  0x15   : > { %1042 = sst [smem:[#allocation15_spill]] %s843_s26  ;;  %p123_p7 = scmp.eq.s32.totalorder %s827_s0, 1 }
  0x16   : > { %s1043_s27 = scalar_select %p845_p6, 1, 0 }
  0x17   : > { %p129_p8 = scmp.eq.s32.totalorder %s508_s22, 1  ;;  %p566_p10 = scmp.lt.s32.totalorder %s769_s21, 2 }
  0x18   : > { %p852_p11 = por %p123_p7, %p41_p0  ;;  %s1037_s30 = sand.u32 1, %s765_s20  }
  0x19   : > { %p856_p12 = por %p129_p8, %p47_p3  ;;  %s862_s5 = sshll.u32 %s769_s21, 6 }
  0x1a   : > { %s1044_s28 = scalar_select %p852_p11, 1, 0 }
  0x1b   : > { %s1045_s29 = scalar_select %p856_p12, 1, 0 }
  0x1c   : > { %s866_s6 = sshll.u32 %s1037_s30, 2  ;;  %p868_p13 = pnand %p566_p10, %p43_p5 }
  0x1d   : > { %s167_s8 = sand.u32 1, %s769_s21   ;;  %s1047_s2 = sld [smem:[#allocation17_spill]] }
  0x1e   : > { %s171_s12 = scalar_lea.vmem [#allocation7], %s866_s6  ;;  %s881_s14 = scalar_lea.sflag [#allocation8], %s167_s8 }
  0x1f   : > { %s178_s13 = sshll.u32 %s171_s12, 4  ;;  %p887_p2 = pneg %p868_p13  ;;  %s179_s13 = int_to_ptr.vmem [resolvable:$true] %s178_s13 }
  0x23   : > { %s877_s11 = scalar_lea.hbm %s1047_s2, %s862_s5  ;;  %s620_s24 = scalar_lea.hbm %s1047_s2, 128 }
  0x24   : > { %s615_s15 = scalar_lea.hbm %s877_s11, 64  ;;  %p621_p5 = scmp.lt.s32.totalorder %s877_s11, %s1047_s2 }
  0x25   : > { %p616_p1 = scmp.ne.s32.totalorder %s877_s11, %s615_s15  ;;  %p622_p7 = scmp.lt.s32.totalorder %s620_s24, %s615_s15 }
  0x27   : > { %p618_p3 = pnand %p887_p2, %p616_p1  ;;  %p623_p8 = por %p622_p7, %p621_p5 }
  0x29   : > { %p619_p4 = pneg %p618_p3 }
  0x2b   : > { %p624_p10 = pnand %p623_p8, %p619_p4 }
  0x2d   : > { %627 = shalt.err (!%p624_p10)
}
  0x2e   : > { %s628_s8 = scalar_lea.vmem %s179_s13, 64  ;;  %s772_s10 = smov [#allocation7]  }
  0x2f   : > { %p629_p9 = scmp.ne.s32.totalorder %s179_s13, %s628_s8  ;;  %s633_s12 = sshll.u32 %s772_s10, 4  ;;  %s634_s12 = int_to_ptr.vmem [resolvable:$false] %s633_s12 }
  0x30   : > { %s635_s30 = scalar_lea.vmem %s634_s12, 128  ;;  %p636_p1 = scmp.lt.s32.totalorder %s179_s13, %s634_s12 }
  0x31   : > { %p631_p0 = pnand %p629_p9, %p887_p2  ;;  %p637_p3 = scmp.lt.s32.totalorder %s635_s30, %s628_s8 }
  0x33   : > { %p632_p12 = pneg %p631_p0  ;;  %p638_p11 = por %p637_p3, %p636_p1 }
  0x35   : > { %p639_p6 = pnand %p638_p11, %p632_p12 }
  0x37   : > { %642 = shalt.err (!%p639_p6)
}
  0x38   : > { %558 = dma.hbm_to_vmem [thread:$0]  (!%p868_p13), %s877_s11, 64, %s179_s13, %s881_s14  }
  0x39   : > { %p201_p9 = scmp.lt.s32.totalorder %s769_s21, 3  ;;  %s1049_s1 = sld [smem:[#allocation16_spill]] }
  0x3a   : > { %p1050_p0 = scmp.ge.s32.totalorder %s769_s21, 1  ;;  %s153_s24 = scalar_lea.vmem [#allocation4], %s866_s6 }
  0x3b   : > { %s160_s25 = sshll.u32 %s153_s24, 4  ;;  %s1052_s9 = sand.u32 1, %s765_s20   ;;  %s161_s25 = int_to_ptr.vmem [resolvable:$true] %s160_s25 }
  0x3c   : > { %p915_p6 = pnand %p1050_p0, %p201_p9  ;;  %s150_s8 = scalar_lea.sflag [#allocation5], %s1052_s9 }
  0x3e   : > { %s1051_s30 = scalar_select %p915_p6, 1, 0 }
  0x3f   : > { %s911_s22 = scalar_lea.hbm %s1049_s1, %s862_s5  ;;  %s648_s12 = scalar_lea.hbm %s1049_s1, 128 }
  0x40   : > { %s643_s11 = scalar_lea.hbm %s911_s22, 64  ;;  %p649_p5 = scmp.lt.s32.totalorder %s911_s22, %s1049_s1 }
  0x41   : > { %p644_p11 = scmp.ne.s32.totalorder %s911_s22, %s643_s11  ;;  %p650_p7 = scmp.lt.s32.totalorder %s648_s12, %s643_s11 }
  0x43   : > { %p646_p12 = pnand %p644_p11, %p887_p2  ;;  %p651_p8 = por %p650_p7, %p649_p5 }
  0x45   : > { %p647_p4 = pneg %p646_p12 }
  0x47   : > { %p652_p10 = pnand %p651_p8, %p647_p4 }
  0x49   : > { %655 = shalt.err (!%p652_p10)
}
  0x4a   : > { %s656_s24 = scalar_lea.vmem %s161_s25, 64  ;;  %s773_s9 = smov [#allocation4]  }
  0x4b   : > { %p657_p1 = scmp.ne.s32.totalorder %s161_s25, %s656_s24  ;;  %s661_s2 = sshll.u32 %s773_s9, 4  ;;  %s662_s2 = int_to_ptr.vmem [resolvable:$false] %s661_s2 }
  0x4c   : > { %s663_s26 = scalar_lea.vmem %s662_s2, 128  ;;  %p664_p0 = scmp.lt.s32.totalorder %s161_s25, %s662_s2 }
  0x4d   : > { %p659_p3 = pnand %p657_p1, %p887_p2  ;;  %p665_p11 = scmp.lt.s32.totalorder %s663_s26, %s656_s24 }
  0x4f   : > { %p660_p9 = pneg %p659_p3  ;;  %p666_p12 = por %p665_p11, %p664_p0 }
  0x51   : > { %p667_p6 = pnand %p666_p12, %p660_p9 }
  0x53   : > { %670 = shalt.err (!%p667_p6)
}
  0x54   : > { %555 = dma.hbm_to_vmem [thread:$0]  (!%p868_p13), %s911_s22, 64, %s161_s25, %s150_s8  }
  0x55   : > { %s194_s10 = scalar_lea.hbm %s1035_s3, %s862_s5  ;;  %s189_s12 = scalar_lea.vmem [#allocation9], %s866_s6 }
  0x56   : > { %s196_s15 = sshll.u32 %s189_s12, 4  ;;  %s671_s17 = scalar_lea.hbm %s194_s10, 64  ;;  %s197_s15 = int_to_ptr.vmem [resolvable:$true] %s196_s15 }
  0x57   : > { %p672_p4 = scmp.ne.s32.totalorder %s194_s10, %s671_s17  ;;  %s676_s24 = scalar_lea.hbm %s1035_s3, 128 }
  0x58   : > { %p677_p6 = scmp.lt.s32.totalorder %s194_s10, %s1035_s3  ;;  %p678_p8 = scmp.lt.s32.totalorder %s676_s24, %s671_s17 }
  0x59   : > { %p674_p5 = pnand %p672_p4, %p887_p2 }
  0x5a   : > { %p679_p10 = por %p678_p8, %p677_p6 }
  0x5b   : > { %p675_p7 = pneg %p674_p5 }
  0x5d   : > { %p680_p1 = pnand %p679_p10, %p675_p7 }
  0x5f   : > { %683 = shalt.err (!%p680_p1)
}
  0x60   : > { %s684_s5 = scalar_lea.vmem %s197_s15, 64  ;;  %s774_s6 = smov [#allocation9]  }
  0x61   : > { %p685_p3 = scmp.ne.s32.totalorder %s197_s15, %s684_s5  ;;  %s689_s22 = sshll.u32 %s774_s6, 4  ;;  %s690_s22 = int_to_ptr.vmem [resolvable:$false] %s689_s22 }
  0x62   : > { %s691_s25 = scalar_lea.vmem %s690_s22, 128  ;;  %p692_p11 = scmp.lt.s32.totalorder %s197_s15, %s690_s22 }
  0x63   : > { %p687_p9 = pnand %p685_p3, %p887_p2  ;;  %p693_p12 = scmp.lt.s32.totalorder %s691_s25, %s684_s5 }
  0x65   : > { %p688_p0 = pneg %p687_p9  ;;  %p694_p4 = por %p693_p12, %p692_p11 }
  0x67   : > { %p695_p5 = pnand %p694_p4, %p688_p0 }
  0x69   : > { %698 = shalt.err (!%p695_p5)
}
  0x6a   : > { %561 = dma.hbm_to_vmem [thread:$0]  (!%p868_p13), %s194_s10, 64, %s197_s15, %s881_s14  }
  0x6b   : > { %p1053_p7 = scmp.ne.s32.totalorder %s1051_s30, 0 }
  0x6c   : > { %s959_s1 = sand.u32 (!%p1053_p7), 1, %s761_s19   ;;  %p1054_p2 = scmp.ne.s32.totalorder (!%p1053_p7), %s1043_s27, 0 }
  0x6d   : > { %205 = sbr.rel (%p1053_p7) target bundleno = 847 (0x34f), region = 32  ;;  %s962_s16 = sshll.u32 (!%p1053_p7), %s959_s1, 2 }
  0x6e   : > { %s208_s8 = scalar_lea.sflag (!%p1053_p7), [#allocation5], %s959_s1  ;;  %s211_s11 = scalar_lea.vmem (!%p1053_p7), [#allocation4], %s962_s16 }
  0x72   : > { %744 = dma.done.wait (%p1054_p2), %s208_s8, 64  }
  0x73   : > { %746 = vsyncadd (%p1054_p2), %s208_s8, 4294967232  ;;  %s216_s7 = sand.u32 1, %s827_s0   ;;  %s220_s30 = scalar_lea.vmem [#allocation7], %s962_s16 }
  0x74   : > { %s217_s14 = scalar_lea.sflag [#allocation8], %s216_s7 }
  0x75   : > { %748 = dma.done.wait (%p1054_p2), %s217_s14, 128  }
  0x76   : > { %750 = vsyncadd (%p1054_p2), %s217_s14, 4294967168  ;;  %v775_v0 = vmov 0.0   ;;  %vm776_vm0 = vmmov 0   ;;  %vm266_vm1 = vcmask 261120   ;;  %v264_v1 = vld [vmem:[%s220_s30] sm:$0xf]  ;;  %v314_v4 = vlaneseq }
  0x77   : > { %532 = vmatprep.subr.bf16.mxu0 %v775_v0  ;;  %534 = vmatprep.mubr.msk.bf16.mxu0 %vm776_vm0, %v775_v0  ;;  %v271_v2 = vsel %vm266_vm1, %v264_v1, 0  ;;  %v263_v3 = vld [vmem:[%s211_s11] sm:$0xf]  ;;  %s313_s13 = sld [smem:[#allocation3 + %s827_s0]]  ;;  %vm320_vm3 = vcmask 64512   ;;  %vm336_vm4 = vcmask 1043456  }
  0x78   : > { %538 = vmatprep.subr.bf16.mxu1 %v775_v0  ;;  %540 = vmatprep.mubr.msk.bf16.mxu1 %vm776_vm0, %v775_v0  ;;  %v315_v5 = vand.u32 127, %v314_v4  ;;  %s229_s27 = scalar_lea.vmem [#allocation9], %s962_s16  ;;  %s521_s10 = sshll.u32 %s959_s1, 3 }
  0x79   : > { %533 = vmatpush3.bf16.xpose.msra.mxu0 %v271_v2  ;;  %v265_v19 = vld [vmem:[%s229_s27] sm:$0xf]  ;;  %s525_s12 = sshll.u32 %s827_s0, 7  ;;  %s261_s15 = scalar_lea.vmem [#allocation10], %s521_s10 }
  0x7a   : > { %v338_v20 = vsel %vm336_vm4, %v265_v19, 0  ;;  %s395_s17 = sshll.u32 %s261_s15, 4  ;;  %s988_s24 = scalar_lea.hbm %s1036_s4, %s525_s12  ;;  %s990_s17 = int_to_ptr.vmem [resolvable:$true] %s395_s17 }
  0x7b   : > { %539 = vmatpush3.bf16.msra.mxu1 %v338_v20  ;;  %s382_s9 = scalar_lea.sflag [#allocation6], %s959_s1  ;;  %s699_s5 = scalar_lea.vmem %s990_s17, 128 }
  0x7c   : > { %p700_p13 = scmp.ne.s32.totalorder %s990_s17, %s699_s5  ;;  %p1055_p6 = scmp.ne.s32.totalorder %s1044_s28, 0 }
  0x7d   : > { %v316_v6 = vstv %s313_s13  ;;  %s777_s0 = smov [#allocation10]  }
  0x7e   : > { %vm317_vm2 = vcmp.lt.s32.totalorder %v315_v5, %v316_v6  ;;  %p701_p8 = pnand %p700_p13, %p1055_p6  ;;  %s703_s6 = sshll.u32 %s777_s0, 4  ;;  %s704_s6 = int_to_ptr.vmem [resolvable:$false] %s703_s6 }
  0x7f   : > { %s705_s22 = scalar_lea.vmem %s704_s6, 256  ;;  %p706_p1 = scmp.lt.s32.totalorder %s990_s17, %s704_s6 }
  0x80   : > { %535 = vmatmul.mubr.msk.bf16.vlgmr.msra.gmra.mxu0 %vm266_vm1, %v263_v3  ;;  %p702_p10 = pneg %p701_p8  ;;  %p707_p3 = scmp.lt.s32.totalorder %s705_s22, %s699_s5 }
  0x82   : > { %p708_p9 = por %p707_p3, %p706_p1 }
  0x84   : > { %p709_p0 = pnand %p708_p9, %p702_p10 }
 0x140   : > { %v307_v7 = vpop.f32.mrf.mxu0 }
 0x141   : > { %v318_v8 = vmul.f32 0.17677669, %v307_v7 }
 0x142   : > { %v536_v9 = vpop.f32.mrf.mxu0 }
 0x143   : > { %v319_v10 = vsel %vm317_vm2, %v318_v8, -1000000.0 }
 0x144   : > { %v310_v11 = vpop.f32.mrf.mxu0  ;;  %v321_v12 = vsel %vm320_vm3, %v319_v10, -inf }
 0x145   : > { %322 = vmax.xlane.f32.xlu0 %v321_v12 }
 0x146   : > { %v537_v13 = vpop.f32.mrf.mxu0 }
 0x1ce   : > { %v323_v14 = vpop.xlane.xlu0 %322 }
 0x1cf   : > { %v324_v15 = vsub.f32 %v319_v10, %v323_v14 }
 0x1d1   : > { %v325_v16 = vmul.f32 1.442695, %v324_v15 }
 0x1d3   : > { %603 = vpow2.f32 %v325_v16 }
 0x1e0   : > { %v604_v17 = vpop.eup %603 }
 0x1e1   : > { %v327_v18 = vsel %vm320_vm3, %v604_v17, 0.0 }
 0x1e2   : > { %328 = vadd.xlane.f32.xlu0 %v327_v18 }
 0x26b   : > { %v329_v21 = vpop.xlane.xlu0 %328 }
 0x26c   : > { %605 = vrcp.f32 %v329_v21 }
 0x279   : > { %v606_v22 = vpop.eup %605 }
 0x27a   : > { %v331_v23 = vmul.f32 %v606_v22, %v604_v17 }
 0x27c   : > { %v332_v24 = vpack.c.bf16 %v331_v23, %v331_v23 }
 0x27e   : > { %541 = vmatmul.mubr.msk.bf16.vlgmr.msra.gmra.mxu1 %vm320_vm3, %v332_v24 }
 0x33e   : > { %v374_v25 = vpop.f32.mrf.mxu1 }
 0x33f   : > { %380 = vst.msk [vmem:[%s261_s15] sm:$0xff] %vm266_vm1, %v374_v25 }
 0x340   : > { %v542_v26 = vpop.f32.mrf.mxu1 }
 0x341   : > { %712 = shalt.err (!%p709_p0)
}
 0x342   : > { %s713_s25 = scalar_lea.hbm %s988_s24, 128  ;;  %s717_s8 = scalar_lea.hbm %s1036_s4, 256 }
 0x343   : > { %p714_p11 = scmp.ne.s32.totalorder %s988_s24, %s713_s25  ;;  %p718_p5 = scmp.lt.s32.totalorder %s988_s24, %s1036_s4 }
 0x344   : > { %p719_p7 = scmp.lt.s32.totalorder %s717_s8, %s713_s25 }
 0x345   : > { %p715_p12 = pnand %p714_p11, %p1055_p6 }
 0x346   : > { %p720_p2 = por %p719_p7, %p718_p5 }
 0x347   : > { %p716_p4 = pneg %p715_p12 }
 0x349   : > { %p721_p13 = pnand %p720_p2, %p716_p4 }
 0x34b   : > { %724 = shalt.err (!%p721_p13)
}
 0x34c   : > { %550 = dma.vmem_to_hbm [thread:$0]  (%p1055_p6), %s990_s17, 128, %s988_s24, %s382_s9   ;;  %v377_v27 = vpop.f32.mrf.mxu1 }
 0x34e   : > { %v543_v28 = vpop.f32.mrf.mxu1 }
 0x34f PF: > { %s407_s14 = sand.u32 1, %s757_s18   ;;  %p1056_p8 = scmp.ne.s32.totalorder %s1045_s29, 0 }
 0x350   : > { %p1057_p10 = scmp.ge.s32.totalorder %s769_s21, 2  ;;  %s408_s30 = scalar_lea.sflag [#allocation6], %s407_s14 }
 0x352   : > { %p563_p1 = pnand %p1057_p10, %p1056_p8 }
 0x354   : > { %p564_p3 = pneg %p563_p1 }
 0x356   : > { %752 = dma.done.wait (%p564_p3), %s408_s30, 128  }
 0x357   : > { %754 = vsyncadd (%p564_p3), %s408_s30, 4294967168  ;;  %s1058_s28 = sld [smem:[#allocation15_spill]]  ;;  %p24_p6 = scmp.ge.s32.totalorder %s831_s23, 4  }
 0x358   : > { %s1059_s18 = smov %s761_s19  ;;  %s1060_s19 = smov %s765_s20 }
 0x359   : > { %s1062_s21 = smov %s831_s23  ;;  %26 = sbr.rel (!%p24_p6) target bundleno = 14 (0xe), region = 101 }
 0x35d   : > { %s1061_s20 = smov %s1058_s28 }
 0x35e   :  { %413 = vsyncpa [#allocation5], 1 }
 0x35f   :  { %415 = vsyncpa [#allocation5 + $0x1], 1 }
 0x360   :  { %416 = vsyncpa [#allocation8], 1 }
 0x361   :  { %418 = vsyncpa [#allocation8 + $0x1], 1 }
 0x362   :  { %419 = vsyncpa [#allocation6], 1 }
 0x363   :  { %421 = vsyncpa [#allocation6 + $0x1], 1 }

</bundles_post_ra>
